<compile_context>
chip_gen: v7x
topology: tpu7x:2x2x1
jax: 0.10.0
libtpu: 0.0.40
codegen_flags: <defaults>
</compile_context>

<pallas_src>
import functools
import math

import jax
import jax.numpy as jnp
from jax.experimental import pallas as pl
from jax.experimental.pallas import tpu as pltpu

# ----------------------------- configuration -------------------------------
N_BATCH = 2
SEQ = 8
EMBED = 32
HEADS = 4
HEAD_DIM = EMBED // HEADS
FWD_EXP = 4
HIDDEN = FWD_EXP * EMBED
LN_EPS = 1e-5


# ------------------------------- kernel ------------------------------------
def transformer_block_kernel(
    qkv_ref, mask_ref,
    wqkv_ref,                        # fused block-diag QKV projection (3E, 3E)
    wfc_ref, bfc_ref,                # attention output proj (E, E), (1, E)
    g1_ref, be1_ref,                 # LayerNorm1 gamma/beta (1, E)
    w1_ref, bb1_ref,                 # FFN linear1 (E, HIDDEN), (1, HIDDEN)
    w2_ref, bb2_ref,                 # FFN linear2 (HIDDEN, E), (1, E)
    g2_ref, be2_ref,                 # LayerNorm2 gamma/beta (1, E)
    out_ref,
    att_scratch,                     # VMEM (N*Lq, E) f32 per-head writeback
    *, n_batch, seq_q, seq_k, heads, head_dim,
):
    f32 = jnp.float32
    embed = heads * head_dim

    qkv = qkv_ref[...].astype(f32)                        # (N*L, 3E)  [q | k | v]

    # Fused QKV projection: single 96-lane MXU matmul.  Per-head (D,D)
    # weights are packed block-diagonally; the 1/sqrt(E) softmax scale is
    # already folded into the Q columns (done at param-build time).
    proj = jnp.dot(qkv, wqkv_ref[...], preferred_element_type=f32)   # (N*L, 3E)

    # Additive mask bias, computed once (mask is 0/1 float; 1 == masked out).
    # NOTE: the reference masks energy with -1e20 *before* dividing by
    # sqrt(E) (effectively -1e20/sqrt(E)); here the scale is folded into Q
    # and the bias is added unscaled.  Both saturate exp() to exactly 0 after
    # max-subtraction, so results match.
    neg_bias = mask_ref[...].astype(f32) * f32(-1e20)     # (N, Lq, Lk)

    # Attention: head loop (H static unroll), each dot batched over N via
    # 3-D einsum -- no transposes (contract last dims directly), no
    # concatenates (head outputs slice-stored into VMEM scratch).
    for h in range(heads):                                # static unroll
        lo = h * head_dim
        hi = lo + head_dim
        qh = proj[:, lo:hi].reshape(n_batch, seq_q, head_dim)
        kh = proj[:, embed + lo:embed + hi].reshape(n_batch, seq_k, head_dim)
        vh = proj[:, 2 * embed + lo:2 * embed + hi].reshape(
            n_batch, seq_k, head_dim)

        energy = jnp.einsum("nqd,nkd->nqk", qh, kh,
                            preferred_element_type=f32) + neg_bias
        m = jnp.max(energy, axis=-1, keepdims=True)
        p = jnp.exp(energy - m)
        # approx=False kept: EUP approx recip has ~1e-4 rel error which would
        # eat the whole verification tolerance.
        attn = p * pl.reciprocal(jnp.sum(p, axis=-1, keepdims=True),
                                 approx=False)
        head_out = jnp.einsum("nqk,nkd->nqd", attn, vh,
                              preferred_element_type=f32)
        att_scratch[:, lo:hi] = head_out.reshape(n_batch * seq_q, head_dim)

    # Single fc_out matmul + bias over all heads / batches.
    att = jnp.dot(att_scratch[...], wfc_ref[...],
                  preferred_element_type=f32) + bfc_ref[0]

    # residual + LayerNorm1 (dropout = identity in eval mode)
    x = att + qkv[:, :embed]                              # query slab is first
    mu = jnp.mean(x, axis=-1, keepdims=True)
    var = jnp.mean((x - mu) ** 2, axis=-1, keepdims=True)
    xn = (x - mu) * jax.lax.rsqrt(var + LN_EPS)
    xn = xn * g1_ref[0] + be1_ref[0]

    # feed-forward
    h1 = jnp.dot(xn, w1_ref[...], preferred_element_type=f32) + bb1_ref[0]
    h1 = jnp.maximum(h1, 0.0)
    ff = jnp.dot(h1, w2_ref[...], preferred_element_type=f32) + bb2_ref[0]

    # residual + LayerNorm2 (dropout = identity in eval mode)
    y = ff + xn
    mu2 = jnp.mean(y, axis=-1, keepdims=True)
    var2 = jnp.mean((y - mu2) ** 2, axis=-1, keepdims=True)
    yn = (y - mu2) * jax.lax.rsqrt(var2 + LN_EPS)
    yn = yn * g2_ref[0] + be2_ref[0]

    out_ref[...] = yn.astype(out_ref.dtype)


# ------------------------------- wrapper ------------------------------------
@jax.jit
def transformer_block(value, key, query, mask, params):
    n, lq, e = query.shape
    lk = key.shape[1]
    # Fused-QKV path requires equal q/k/v lengths (true for this block).
    assert lq == lk == value.shape[1]

    # Lane-concatenate [query | key | value] into one (N*L, 3E) slab so the
    # fused projection is a single lane-dense matmul.
    qkv = jnp.concatenate(
        [query.reshape(n * lq, e),
         key.reshape(n * lk, e),
         value.reshape(n * lk, e)], axis=-1)

    kernel = functools.partial(
        transformer_block_kernel,
        n_batch=n, seq_q=lq, seq_k=lk, heads=HEADS, head_dim=e // HEADS)

    # Single invocation, no grid: every operand is a whole-array VMEM block
    # (total working set ~40 KiB), DMA'd exactly once.
    out2 = pl.pallas_call(
        kernel,
        out_shape=jax.ShapeDtypeStruct((n * lq, e), jnp.float32),
        scratch_shapes=[pltpu.VMEM((n * lq, e), jnp.float32)],
    )(
        qkv, mask,
        params["w_qkv"],
        params["wfc"], params["bfc"],
        params["ln1_g"], params["ln1_b"],
        params["w1"], params["b1"],
        params["w2"], params["b2"],
        params["ln2_g"], params["ln2_b"],
    )
    return out2.reshape(n, lq, e)


# --------------------------- pure-JAX reference -----------------------------
def reference_forward(value, key, query, mask, p):
    n, lq, e = query.shape

    def split_heads(x):
        return x.reshape(n, -1, HEADS, HEAD_DIM)

    v = jnp.einsum("nlhd,de->nlhe", split_heads(value), p["wv"])
    k = jnp.einsum("nlhd,de->nlhe", split_heads(key), p["wk"])
    q = jnp.einsum("nlhd,de->nlhe", split_heads(query), p["wq"])

    energy = jnp.einsum("nqhd,nkhd->nhqk", q, k)
    energy = jnp.where(mask[:, None, :, :] == 1.0, -1e20, energy)
    attn = jax.nn.softmax(energy / jnp.sqrt(jnp.float32(e)), axis=3)
    out = jnp.einsum("nhql,nlhd->nqhd", attn, v).reshape(n, lq, e)
    att = out @ p["wfc"] + p["bfc"][0]

    def ln(x, g, b):
        mu = jnp.mean(x, -1, keepdims=True)
        var = jnp.mean((x - mu) ** 2, -1, keepdims=True)
        return (x - mu) / jnp.sqrt(var + LN_EPS) * g[0] + b[0]

    x = ln(att + query, p["ln1_g"], p["ln1_b"])
    ff = jnp.maximum(x @ p["w1"] + p["b1"][0], 0.0) @ p["w2"] + p["b2"][0]
    return ln(ff + x, p["ln2_g"], p["ln2_b"])


# --------------------------------- main --------------------------------------
if __name__ == "__main__":
    root = jax.random.PRNGKey(0)
    keys = jax.random.split(root, 16)

    def init(k, shape, scale=0.1):
        return (scale * jax.random.normal(k, shape)).astype(jnp.float32)

    wv = init(keys[0], (HEAD_DIM, HEAD_DIM))
    wk = init(keys[1], (HEAD_DIM, HEAD_DIM))
    wq = init(keys[2], (HEAD_DIM, HEAD_DIM))

    def block_diag_heads(w):  # (D, D) -> (E, E) block-diag (same weight per head)
        out = jnp.zeros((EMBED, EMBED), jnp.float32)
        for h in range(HEADS):
            out = out.at[h * HEAD_DIM:(h + 1) * HEAD_DIM,
                         h * HEAD_DIM:(h + 1) * HEAD_DIM].set(w)
        return out

    # Fused QKV weight: (3E, 3E), block-diagonal over the {q, k, v} groups,
    # each group block-diagonal over heads; 1/sqrt(E) folded into Q columns.
    scale = 1.0 / math.sqrt(EMBED)
    w_qkv = jnp.zeros((3 * EMBED, 3 * EMBED), jnp.float32)
    w_qkv = w_qkv.at[0:EMBED, 0:EMBED].set(block_diag_heads(wq) * scale)
    w_qkv = w_qkv.at[EMBED:2 * EMBED, EMBED:2 * EMBED].set(block_diag_heads(wk))
    w_qkv = w_qkv.at[2 * EMBED:, 2 * EMBED:].set(block_diag_heads(wv))

    params = {
        "wv": wv, "wk": wk, "wq": wq,
        "w_qkv": w_qkv,
        "wfc": init(keys[3], (EMBED, EMBED)),
        "bfc": init(keys[4], (1, EMBED)),
        "ln1_g": jnp.ones((1, EMBED), jnp.float32),
        "ln1_b": jnp.zeros((1, EMBED), jnp.float32),
        "w1": init(keys[5], (EMBED, HIDDEN)),
        "b1": init(keys[6], (1, HIDDEN)),
        "w2": init(keys[7], (HIDDEN, EMBED)),
        "b2": init(keys[8], (1, EMBED)),
        "ln2_g": jnp.ones((1, EMBED), jnp.float32),
        "ln2_b": jnp.zeros((1, EMBED), jnp.float32),
    }

    value = init(keys[9], (N_BATCH, SEQ, EMBED), scale=1.0)
    key_t = init(keys[10], (N_BATCH, SEQ, EMBED), scale=1.0)
    query = init(keys[11], (N_BATCH, SEQ, EMBED), scale=1.0)
    # causal mask: 1 == masked out (future positions)
    causal = jnp.triu(jnp.ones((SEQ, SEQ), jnp.float32), k=1)
    mask = jnp.broadcast_to(causal, (N_BATCH, SEQ, SEQ))

    out = transformer_block(value, key_t, query, mask, params)
    out = jax.block_until_ready(out)

    ref = reference_forward(value, key_t, query, mask, params)
    assert out.shape == (N_BATCH, SEQ, EMBED)
    assert jnp.allclose(out, ref, rtol=1e-4, atol=1e-4), (
        f"max abs err {jnp.max(jnp.abs(out - ref))}")

    print("KERNEL_OK")
</pallas_src>

<mosaic_0001>
module attributes {stable_mosaic.version = 11 : i64} {
  func.func @transformer_block_kernel(%arg0: memref<16x96xf32, #tpu.memory_space<vmem>>, %arg1: memref<2x8x8xf32, #tpu.memory_space<vmem>>, %arg2: memref<96x96xf32, #tpu.memory_space<vmem>>, %arg3: memref<32x32xf32, #tpu.memory_space<vmem>>, %arg4: memref<1x32xf32, #tpu.memory_space<vmem>>, %arg5: memref<1x32xf32, #tpu.memory_space<vmem>>, %arg6: memref<1x32xf32, #tpu.memory_space<vmem>>, %arg7: memref<32x128xf32, #tpu.memory_space<vmem>>, %arg8: memref<1x128xf32, #tpu.memory_space<vmem>>, %arg9: memref<128x32xf32, #tpu.memory_space<vmem>>, %arg10: memref<1x32xf32, #tpu.memory_space<vmem>>, %arg11: memref<1x32xf32, #tpu.memory_space<vmem>>, %arg12: memref<1x32xf32, #tpu.memory_space<vmem>>, %arg13: memref<16x32xf32, #tpu.memory_space<vmem>>, %arg14: memref<16x32xf32, #tpu.memory_space<vmem>>) attributes {dimension_semantics = [], scalar_prefetch = 0 : i64, scratch_operands = 1 : i64, tpu.core_type = #tpu.core_type<tc>} {
    %c0 = arith.constant 0 : index
    %c0_0 = arith.constant 0 : index
    %0 = vector.load %arg0[%c0, %c0_0] : memref<16x96xf32, #tpu.memory_space<vmem>>, vector<16x96xf32>
    %c0_1 = arith.constant 0 : index
    %c0_2 = arith.constant 0 : index
    %1 = vector.load %arg2[%c0_1, %c0_2] : memref<96x96xf32, #tpu.memory_space<vmem>>, vector<96x96xf32>
    %cst = arith.constant dense<0.000000e+00> : vector<16x96xf32>
    %2 = tpu.matmul %0, %1, %cst {dimension_numbers = #tpu.dot_dimension_numbers<[1], [0], [0], [1], [0, 0, 1, 1], [], []>} : vector<16x96xf32>, vector<96x96xf32>, vector<16x96xf32> -> vector<16x96xf32>
    %c0_3 = arith.constant 0 : index
    %c0_4 = arith.constant 0 : index
    %c0_5 = arith.constant 0 : index
    %3 = vector.load %arg1[%c0_3, %c0_4, %c0_5] : memref<2x8x8xf32, #tpu.memory_space<vmem>>, vector<2x8x8xf32>
    %cst_6 = arith.constant -1.000000e+20 : f32
    %4 = vector.broadcast %cst_6 : f32 to vector<2x8x8xf32>
    %5 = arith.mulf %3, %4 : vector<2x8x8xf32>
    %6 = vector.extract_strided_slice %2 {offsets = [0, 0], sizes = [16, 8], strides = [1, 1]} : vector<16x96xf32> to vector<16x8xf32>
    %7 = vector.shape_cast %6 : vector<16x8xf32> to vector<2x8x8xf32>
    %8 = vector.extract_strided_slice %2 {offsets = [0, 32], sizes = [16, 8], strides = [1, 1]} : vector<16x96xf32> to vector<16x8xf32>
    %9 = vector.shape_cast %8 : vector<16x8xf32> to vector<2x8x8xf32>
    %10 = vector.extract_strided_slice %2 {offsets = [0, 64], sizes = [16, 8], strides = [1, 1]} : vector<16x96xf32> to vector<16x8xf32>
    %11 = vector.shape_cast %10 : vector<16x8xf32> to vector<2x8x8xf32>
    "tpu.trace_start"() <{level = 10 : i32, message = "nqd,nkd->nqk"}> : () -> ()
    %cst_7 = arith.constant dense<0.000000e+00> : vector<2x8x8xf32>
    %12 = tpu.matmul %7, %9, %cst_7 {dimension_numbers = #tpu.dot_dimension_numbers<[2], [2], [1], [1], [0, 0, 0, 1, 1, 1], [0], [0]>} : vector<2x8x8xf32>, vector<2x8x8xf32>, vector<2x8x8xf32> -> vector<2x8x8xf32>
    "tpu.trace_stop"() : () -> ()
    %13 = arith.addf %12, %5 : vector<2x8x8xf32>
    %cst_8 = arith.constant dense<0xFF800000> : vector<2x8xf32>
    %14 = vector.multi_reduction <maximumf>, %13, %cst_8 [2] : vector<2x8x8xf32> to vector<2x8xf32>
    %15 = vector.shape_cast %14 : vector<2x8xf32> to vector<2x8x1xf32>
    %16 = vector.broadcast %15 : vector<2x8x1xf32> to vector<2x8x8xf32>
    %17 = arith.subf %13, %16 : vector<2x8x8xf32>
    %18 = math.exp %17 : vector<2x8x8xf32>
    %cst_9 = arith.constant dense<0.000000e+00> : vector<2x8xf32>
    %19 = vector.multi_reduction <add>, %18, %cst_9 [2] : vector<2x8x8xf32> to vector<2x8xf32>
    %20 = vector.shape_cast %19 : vector<2x8xf32> to vector<2x8x1xf32>
    %21 = tpu.reciprocal %20 : vector<2x8x1xf32> -> vector<2x8x1xf32>
    %22 = vector.broadcast %21 : vector<2x8x1xf32> to vector<2x8x8xf32>
    %23 = arith.mulf %18, %22 : vector<2x8x8xf32>
    "tpu.trace_start"() <{level = 10 : i32, message = "nqk,nkd->nqd"}> : () -> ()
    %cst_10 = arith.constant dense<0.000000e+00> : vector<2x8x8xf32>
    %24 = tpu.matmul %23, %11, %cst_10 {dimension_numbers = #tpu.dot_dimension_numbers<[2], [1], [1], [2], [0, 0, 0, 1, 1, 2], [0], [0]>} : vector<2x8x8xf32>, vector<2x8x8xf32>, vector<2x8x8xf32> -> vector<2x8x8xf32>
    "tpu.trace_stop"() : () -> ()
    %25 = vector.shape_cast %24 : vector<2x8x8xf32> to vector<16x8xf32>
    %c0_11 = arith.constant 0 : index
    %c0_12 = arith.constant 0 : index
    %26 = vector.load %arg14[%c0_11, %c0_12] : memref<16x32xf32, #tpu.memory_space<vmem>>, vector<16x8xf32>
    tpu.vector_store %arg14[%c0_11, %c0_12], %25 {strides = array<i32>} : memref<16x32xf32, #tpu.memory_space<vmem>>, vector<16x8xf32>,
    %27 = vector.extract_strided_slice %2 {offsets = [0, 8], sizes = [16, 8], strides = [1, 1]} : vector<16x96xf32> to vector<16x8xf32>
    %28 = vector.shape_cast %27 : vector<16x8xf32> to vector<2x8x8xf32>
    %29 = vector.extract_strided_slice %2 {offsets = [0, 40], sizes = [16, 8], strides = [1, 1]} : vector<16x96xf32> to vector<16x8xf32>
    %30 = vector.shape_cast %29 : vector<16x8xf32> to vector<2x8x8xf32>
    %31 = vector.extract_strided_slice %2 {offsets = [0, 72], sizes = [16, 8], strides = [1, 1]} : vector<16x96xf32> to vector<16x8xf32>
    %32 = vector.shape_cast %31 : vector<16x8xf32> to vector<2x8x8xf32>
    "tpu.trace_start"() <{level = 10 : i32, message = "nqd,nkd->nqk"}> : () -> ()
    %cst_13 = arith.constant dense<0.000000e+00> : vector<2x8x8xf32>
    %33 = tpu.matmul %28, %30, %cst_13 {dimension_numbers = #tpu.dot_dimension_numbers<[2], [2], [1], [1], [0, 0, 0, 1, 1, 1], [0], [0]>} : vector<2x8x8xf32>, vector<2x8x8xf32>, vector<2x8x8xf32> -> vector<2x8x8xf32>
    "tpu.trace_stop"() : () -> ()
    %34 = arith.addf %33, %5 : vector<2x8x8xf32>
    %cst_14 = arith.constant dense<0xFF800000> : vector<2x8xf32>
    %35 = vector.multi_reduction <maximumf>, %34, %cst_14 [2] : vector<2x8x8xf32> to vector<2x8xf32>
    %36 = vector.shape_cast %35 : vector<2x8xf32> to vector<2x8x1xf32>
    %37 = vector.broadcast %36 : vector<2x8x1xf32> to vector<2x8x8xf32>
    %38 = arith.subf %34, %37 : vector<2x8x8xf32>
    %39 = math.exp %38 : vector<2x8x8xf32>
    %cst_15 = arith.constant dense<0.000000e+00> : vector<2x8xf32>
    %40 = vector.multi_reduction <add>, %39, %cst_15 [2] : vector<2x8x8xf32> to vector<2x8xf32>
    %41 = vector.shape_cast %40 : vector<2x8xf32> to vector<2x8x1xf32>
    %42 = tpu.reciprocal %41 : vector<2x8x1xf32> -> vector<2x8x1xf32>
    %43 = vector.broadcast %42 : vector<2x8x1xf32> to vector<2x8x8xf32>
    %44 = arith.mulf %39, %43 : vector<2x8x8xf32>
    "tpu.trace_start"() <{level = 10 : i32, message = "nqk,nkd->nqd"}> : () -> ()
    %cst_16 = arith.constant dense<0.000000e+00> : vector<2x8x8xf32>
    %45 = tpu.matmul %44, %32, %cst_16 {dimension_numbers = #tpu.dot_dimension_numbers<[2], [1], [1], [2], [0, 0, 0, 1, 1, 2], [0], [0]>} : vector<2x8x8xf32>, vector<2x8x8xf32>, vector<2x8x8xf32> -> vector<2x8x8xf32>
    "tpu.trace_stop"() : () -> ()
    %46 = vector.shape_cast %45 : vector<2x8x8xf32> to vector<16x8xf32>
    %c0_17 = arith.constant 0 : index
    %c8 = arith.constant 8 : index
    %47 = vector.load %arg14[%c0_17, %c8] : memref<16x32xf32, #tpu.memory_space<vmem>>, vector<16x8xf32>
    tpu.vector_store %arg14[%c0_17, %c8], %46 {strides = array<i32>} : memref<16x32xf32, #tpu.memory_space<vmem>>, vector<16x8xf32>,
    %48 = vector.extract_strided_slice %2 {offsets = [0, 16], sizes = [16, 8], strides = [1, 1]} : vector<16x96xf32> to vector<16x8xf32>
    %49 = vector.shape_cast %48 : vector<16x8xf32> to vector<2x8x8xf32>
    %50 = vector.extract_strided_slice %2 {offsets = [0, 48], sizes = [16, 8], strides = [1, 1]} : vector<16x96xf32> to vector<16x8xf32>
    %51 = vector.shape_cast %50 : vector<16x8xf32> to vector<2x8x8xf32>
    %52 = vector.extract_strided_slice %2 {offsets = [0, 80], sizes = [16, 8], strides = [1, 1]} : vector<16x96xf32> to vector<16x8xf32>
    %53 = vector.shape_cast %52 : vector<16x8xf32> to vector<2x8x8xf32>
    "tpu.trace_start"() <{level = 10 : i32, message = "nqd,nkd->nqk"}> : () -> ()
    %cst_18 = arith.constant dense<0.000000e+00> : vector<2x8x8xf32>
    %54 = tpu.matmul %49, %51, %cst_18 {dimension_numbers = #tpu.dot_dimension_numbers<[2], [2], [1], [1], [0, 0, 0, 1, 1, 1], [0], [0]>} : vector<2x8x8xf32>, vector<2x8x8xf32>, vector<2x8x8xf32> -> vector<2x8x8xf32>
    "tpu.trace_stop"() : () -> ()
    %55 = arith.addf %54, %5 : vector<2x8x8xf32>
    %cst_19 = arith.constant dense<0xFF800000> : vector<2x8xf32>
    %56 = vector.multi_reduction <maximumf>, %55, %cst_19 [2] : vector<2x8x8xf32> to vector<2x8xf32>
    %57 = vector.shape_cast %56 : vector<2x8xf32> to vector<2x8x1xf32>
    %58 = vector.broadcast %57 : vector<2x8x1xf32> to vector<2x8x8xf32>
    %59 = arith.subf %55, %58 : vector<2x8x8xf32>
    %60 = math.exp %59 : vector<2x8x8xf32>
    %cst_20 = arith.constant dense<0.000000e+00> : vector<2x8xf32>
    %61 = vector.multi_reduction <add>, %60, %cst_20 [2] : vector<2x8x8xf32> to vector<2x8xf32>
    %62 = vector.shape_cast %61 : vector<2x8xf32> to vector<2x8x1xf32>
    %63 = tpu.reciprocal %62 : vector<2x8x1xf32> -> vector<2x8x1xf32>
    %64 = vector.broadcast %63 : vector<2x8x1xf32> to vector<2x8x8xf32>
    %65 = arith.mulf %60, %64 : vector<2x8x8xf32>
    "tpu.trace_start"() <{level = 10 : i32, message = "nqk,nkd->nqd"}> : () -> ()
    %cst_21 = arith.constant dense<0.000000e+00> : vector<2x8x8xf32>
    %66 = tpu.matmul %65, %53, %cst_21 {dimension_numbers = #tpu.dot_dimension_numbers<[2], [1], [1], [2], [0, 0, 0, 1, 1, 2], [0], [0]>} : vector<2x8x8xf32>, vector<2x8x8xf32>, vector<2x8x8xf32> -> vector<2x8x8xf32>
    "tpu.trace_stop"() : () -> ()
    %67 = vector.shape_cast %66 : vector<2x8x8xf32> to vector<16x8xf32>
    %c0_22 = arith.constant 0 : index
    %c16 = arith.constant 16 : index
    %68 = vector.load %arg14[%c0_22, %c16] : memref<16x32xf32, #tpu.memory_space<vmem>>, vector<16x8xf32>
    tpu.vector_store %arg14[%c0_22, %c16], %67 {strides = array<i32>} : memref<16x32xf32, #tpu.memory_space<vmem>>, vector<16x8xf32>,
    %69 = vector.extract_strided_slice %2 {offsets = [0, 24], sizes = [16, 8], strides = [1, 1]} : vector<16x96xf32> to vector<16x8xf32>
    %70 = vector.shape_cast %69 : vector<16x8xf32> to vector<2x8x8xf32>
    %71 = vector.extract_strided_slice %2 {offsets = [0, 56], sizes = [16, 8], strides = [1, 1]} : vector<16x96xf32> to vector<16x8xf32>
    %72 = vector.shape_cast %71 : vector<16x8xf32> to vector<2x8x8xf32>
    %73 = vector.extract_strided_slice %2 {offsets = [0, 88], sizes = [16, 8], strides = [1, 1]} : vector<16x96xf32> to vector<16x8xf32>
    %74 = vector.shape_cast %73 : vector<16x8xf32> to vector<2x8x8xf32>
    "tpu.trace_start"() <{level = 10 : i32, message = "nqd,nkd->nqk"}> : () -> ()
    %cst_23 = arith.constant dense<0.000000e+00> : vector<2x8x8xf32>
    %75 = tpu.matmul %70, %72, %cst_23 {dimension_numbers = #tpu.dot_dimension_numbers<[2], [2], [1], [1], [0, 0, 0, 1, 1, 1], [0], [0]>} : vector<2x8x8xf32>, vector<2x8x8xf32>, vector<2x8x8xf32> -> vector<2x8x8xf32>
    "tpu.trace_stop"() : () -> ()
    %76 = arith.addf %75, %5 : vector<2x8x8xf32>
    %cst_24 = arith.constant dense<0xFF800000> : vector<2x8xf32>
    %77 = vector.multi_reduction <maximumf>, %76, %cst_24 [2] : vector<2x8x8xf32> to vector<2x8xf32>
    %78 = vector.shape_cast %77 : vector<2x8xf32> to vector<2x8x1xf32>
    %79 = vector.broadcast %78 : vector<2x8x1xf32> to vector<2x8x8xf32>
    %80 = arith.subf %76, %79 : vector<2x8x8xf32>
    %81 = math.exp %80 : vector<2x8x8xf32>
    %cst_25 = arith.constant dense<0.000000e+00> : vector<2x8xf32>
    %82 = vector.multi_reduction <add>, %81, %cst_25 [2] : vector<2x8x8xf32> to vector<2x8xf32>
    %83 = vector.shape_cast %82 : vector<2x8xf32> to vector<2x8x1xf32>
    %84 = tpu.reciprocal %83 : vector<2x8x1xf32> -> vector<2x8x1xf32>
    %85 = vector.broadcast %84 : vector<2x8x1xf32> to vector<2x8x8xf32>
    %86 = arith.mulf %81, %85 : vector<2x8x8xf32>
    "tpu.trace_start"() <{level = 10 : i32, message = "nqk,nkd->nqd"}> : () -> ()
    %cst_26 = arith.constant dense<0.000000e+00> : vector<2x8x8xf32>
    %87 = tpu.matmul %86, %74, %cst_26 {dimension_numbers = #tpu.dot_dimension_numbers<[2], [1], [1], [2], [0, 0, 0, 1, 1, 2], [0], [0]>} : vector<2x8x8xf32>, vector<2x8x8xf32>, vector<2x8x8xf32> -> vector<2x8x8xf32>
    "tpu.trace_stop"() : () -> ()
    %88 = vector.shape_cast %87 : vector<2x8x8xf32> to vector<16x8xf32>
    %c0_27 = arith.constant 0 : index
    %c24 = arith.constant 24 : index
    %89 = vector.load %arg14[%c0_27, %c24] : memref<16x32xf32, #tpu.memory_space<vmem>>, vector<16x8xf32>
    tpu.vector_store %arg14[%c0_27, %c24], %88 {strides = array<i32>} : memref<16x32xf32, #tpu.memory_space<vmem>>, vector<16x8xf32>,
    %c0_28 = arith.constant 0 : index
    %c0_29 = arith.constant 0 : index
    %90 = vector.load %arg14[%c0_28, %c0_29] : memref<16x32xf32, #tpu.memory_space<vmem>>, vector<16x32xf32>
    %c0_30 = arith.constant 0 : index
    %c0_31 = arith.constant 0 : index
    %91 = vector.load %arg3[%c0_30, %c0_31] : memref<32x32xf32, #tpu.memory_space<vmem>>, vector<32x32xf32>
    %cst_32 = arith.constant dense<0.000000e+00> : vector<16x32xf32>
    %92 = tpu.matmul %90, %91, %cst_32 {dimension_numbers = #tpu.dot_dimension_numbers<[1], [0], [0], [1], [0, 0, 1, 1], [], []>} : vector<16x32xf32>, vector<32x32xf32>, vector<16x32xf32> -> vector<16x32xf32>
    %c0_33 = arith.constant 0 : index
    %c0_34 = arith.constant 0 : index
    %93 = vector.load %arg4[%c0_33, %c0_34] : memref<1x32xf32, #tpu.memory_space<vmem>>, vector<1x32xf32>
    %94 = vector.shape_cast %93 : vector<1x32xf32> to vector<32xf32>
    %95 = vector.shape_cast %94 : vector<32xf32> to vector<1x32xf32>
    %96 = vector.broadcast %95 : vector<1x32xf32> to vector<16x32xf32>
    %97 = arith.addf %92, %96 : vector<16x32xf32>
    %98 = vector.extract_strided_slice %0 {offsets = [0, 0], sizes = [16, 32], strides = [1, 1]} : vector<16x96xf32> to vector<16x32xf32>
    %99 = arith.addf %97, %98 : vector<16x32xf32>
    %cst_35 = arith.constant dense<0.000000e+00> : vector<16xf32>
    %100 = vector.multi_reduction <add>, %99, %cst_35 [1] : vector<16x32xf32> to vector<16xf32>
    %101 = vector.shape_cast %100 : vector<16xf32> to vector<16x1xf32>
    %cst_36 = arith.constant 3.200000e+01 : f32
    %102 = vector.broadcast %cst_36 : f32 to vector<16x1xf32>
    %103 = arith.divf %101, %102 : vector<16x1xf32>
    %104 = vector.broadcast %103 : vector<16x1xf32> to vector<16x32xf32>
    %105 = arith.subf %99, %104 : vector<16x32xf32>
    %106 = arith.mulf %105, %105 : vector<16x32xf32>
    %cst_37 = arith.constant dense<0.000000e+00> : vector<16xf32>
    %107 = vector.multi_reduction <add>, %106, %cst_37 [1] : vector<16x32xf32> to vector<16xf32>
    %108 = vector.shape_cast %107 : vector<16xf32> to vector<16x1xf32>
    %cst_38 = arith.constant 3.200000e+01 : f32
    %109 = vector.broadcast %cst_38 : f32 to vector<16x1xf32>
    %110 = arith.divf %108, %109 : vector<16x1xf32>
    %111 = vector.broadcast %103 : vector<16x1xf32> to vector<16x32xf32>
    %112 = arith.subf %99, %111 : vector<16x32xf32>
    %cst_39 = arith.constant 9.99999974E-6 : f32
    %113 = vector.broadcast %cst_39 : f32 to vector<16x1xf32>
    %114 = arith.addf %110, %113 : vector<16x1xf32>
    %115 = math.rsqrt %114 : vector<16x1xf32>
    %116 = vector.broadcast %115 : vector<16x1xf32> to vector<16x32xf32>
    %117 = arith.mulf %112, %116 : vector<16x32xf32>
    %c0_40 = arith.constant 0 : index
    %c0_41 = arith.constant 0 : index
    %118 = vector.load %arg5[%c0_40, %c0_41] : memref<1x32xf32, #tpu.memory_space<vmem>>, vector<1x32xf32>
    %119 = vector.shape_cast %118 : vector<1x32xf32> to vector<32xf32>
    %120 = vector.shape_cast %119 : vector<32xf32> to vector<1x32xf32>
    %121 = vector.broadcast %120 : vector<1x32xf32> to vector<16x32xf32>
    %122 = arith.mulf %117, %121 : vector<16x32xf32>
    %c0_42 = arith.constant 0 : index
    %c0_43 = arith.constant 0 : index
    %123 = vector.load %arg6[%c0_42, %c0_43] : memref<1x32xf32, #tpu.memory_space<vmem>>, vector<1x32xf32>
    %124 = vector.shape_cast %123 : vector<1x32xf32> to vector<32xf32>
    %125 = vector.shape_cast %124 : vector<32xf32> to vector<1x32xf32>
    %126 = vector.broadcast %125 : vector<1x32xf32> to vector<16x32xf32>
    %127 = arith.addf %122, %126 : vector<16x32xf32>
    %c0_44 = arith.constant 0 : index
    %c0_45 = arith.constant 0 : index
    %128 = vector.load %arg7[%c0_44, %c0_45] : memref<32x128xf32, #tpu.memory_space<vmem>>, vector<32x128xf32>
    %cst_46 = arith.constant dense<0.000000e+00> : vector<16x128xf32>
    %129 = tpu.matmul %127, %128, %cst_46 {dimension_numbers = #tpu.dot_dimension_numbers<[1], [0], [0], [1], [0, 0, 1, 1], [], []>} : vector<16x32xf32>, vector<32x128xf32>, vector<16x128xf32> -> vector<16x128xf32>
    %c0_47 = arith.constant 0 : index
    %c0_48 = arith.constant 0 : index
    %130 = vector.load %arg8[%c0_47, %c0_48] : memref<1x128xf32, #tpu.memory_space<vmem>>, vector<1x128xf32>
    %131 = vector.shape_cast %130 : vector<1x128xf32> to vector<128xf32>
    %132 = vector.shape_cast %131 : vector<128xf32> to vector<1x128xf32>
    %133 = vector.broadcast %132 : vector<1x128xf32> to vector<16x128xf32>
    %134 = arith.addf %129, %133 : vector<16x128xf32>
    %cst_49 = arith.constant 0.000000e+00 : f32
    %135 = vector.broadcast %cst_49 : f32 to vector<16x128xf32>
    %136 = arith.maximumf %134, %135 : vector<16x128xf32>
    %c0_50 = arith.constant 0 : index
    %c0_51 = arith.constant 0 : index
    %137 = vector.load %arg9[%c0_50, %c0_51] : memref<128x32xf32, #tpu.memory_space<vmem>>, vector<128x32xf32>
    %cst_52 = arith.constant dense<0.000000e+00> : vector<16x32xf32>
    %138 = tpu.matmul %136, %137, %cst_52 {dimension_numbers = #tpu.dot_dimension_numbers<[1], [0], [0], [1], [0, 0, 1, 1], [], []>} : vector<16x128xf32>, vector<128x32xf32>, vector<16x32xf32> -> vector<16x32xf32>
    %c0_53 = arith.constant 0 : index
    %c0_54 = arith.constant 0 : index
    %139 = vector.load %arg10[%c0_53, %c0_54] : memref<1x32xf32, #tpu.memory_space<vmem>>, vector<1x32xf32>
    %140 = vector.shape_cast %139 : vector<1x32xf32> to vector<32xf32>
    %141 = vector.shape_cast %140 : vector<32xf32> to vector<1x32xf32>
    %142 = vector.broadcast %141 : vector<1x32xf32> to vector<16x32xf32>
    %143 = arith.addf %138, %142 : vector<16x32xf32>
    %144 = arith.addf %143, %127 : vector<16x32xf32>
    %cst_55 = arith.constant dense<0.000000e+00> : vector<16xf32>
    %145 = vector.multi_reduction <add>, %144, %cst_55 [1] : vector<16x32xf32> to vector<16xf32>
    %146 = vector.shape_cast %145 : vector<16xf32> to vector<16x1xf32>
    %cst_56 = arith.constant 3.200000e+01 : f32
    %147 = vector.broadcast %cst_56 : f32 to vector<16x1xf32>
    %148 = arith.divf %146, %147 : vector<16x1xf32>
    %149 = vector.broadcast %148 : vector<16x1xf32> to vector<16x32xf32>
    %150 = arith.subf %144, %149 : vector<16x32xf32>
    %151 = arith.mulf %150, %150 : vector<16x32xf32>
    %cst_57 = arith.constant dense<0.000000e+00> : vector<16xf32>
    %152 = vector.multi_reduction <add>, %151, %cst_57 [1] : vector<16x32xf32> to vector<16xf32>
    %153 = vector.shape_cast %152 : vector<16xf32> to vector<16x1xf32>
    %cst_58 = arith.constant 3.200000e+01 : f32
    %154 = vector.broadcast %cst_58 : f32 to vector<16x1xf32>
    %155 = arith.divf %153, %154 : vector<16x1xf32>
    %156 = vector.broadcast %148 : vector<16x1xf32> to vector<16x32xf32>
    %157 = arith.subf %144, %156 : vector<16x32xf32>
    %cst_59 = arith.constant 9.99999974E-6 : f32
    %158 = vector.broadcast %cst_59 : f32 to vector<16x1xf32>
    %159 = arith.addf %155, %158 : vector<16x1xf32>
    %160 = math.rsqrt %159 : vector<16x1xf32>
    %161 = vector.broadcast %160 : vector<16x1xf32> to vector<16x32xf32>
    %162 = arith.mulf %157, %161 : vector<16x32xf32>
    %c0_60 = arith.constant 0 : index
    %c0_61 = arith.constant 0 : index
    %163 = vector.load %arg11[%c0_60, %c0_61] : memref<1x32xf32, #tpu.memory_space<vmem>>, vector<1x32xf32>
    %164 = vector.shape_cast %163 : vector<1x32xf32> to vector<32xf32>
    %165 = vector.shape_cast %164 : vector<32xf32> to vector<1x32xf32>
    %166 = vector.broadcast %165 : vector<1x32xf32> to vector<16x32xf32>
    %167 = arith.mulf %162, %166 : vector<16x32xf32>
    %c0_62 = arith.constant 0 : index
    %c0_63 = arith.constant 0 : index
    %168 = vector.load %arg12[%c0_62, %c0_63] : memref<1x32xf32, #tpu.memory_space<vmem>>, vector<1x32xf32>
    %169 = vector.shape_cast %168 : vector<1x32xf32> to vector<32xf32>
    %170 = vector.shape_cast %169 : vector<32xf32> to vector<1x32xf32>
    %171 = vector.broadcast %170 : vector<1x32xf32> to vector<16x32xf32>
    %172 = arith.addf %167, %171 : vector<16x32xf32>
    %c0_64 = arith.constant 0 : index
    %c0_65 = arith.constant 0 : index
    %173 = vector.load %arg13[%c0_64, %c0_65] : memref<16x32xf32, #tpu.memory_space<vmem>>, vector<16x32xf32>
    tpu.vector_store %arg13[%c0_64, %c0_65], %172 {strides = array<i32>} : memref<16x32xf32, #tpu.memory_space<vmem>>, vector<16x32xf32>,
    return
  }
}

</mosaic_0001>

<bundles_post_ra>
// kernel: transformer_block.1
= control target key start
LH: loop header
LB: loop body
LE: loop exit
PB: predicated region body
PF: predicated region fallthrough
CT: control target
= control target key end

     0   :  { %vm59_vm0 = vcmask 785408   ;;  %s2736_s0 = inlined_call_operand.vmem [shape: f32[16,96], index: 0, kind: input, shape index: {}]   ;;  %s2737_s1 = inlined_call_operand.vmem [shape: f32[2,8,8], index: 1, kind: input, shape index: {}]   ;;  %s2738_s2 = inlined_call_operand.vmem [shape: f32[96,96], index: 2, kind: input, shape index: {}]   ;;  %s2739_s3 = inlined_call_operand.vmem [shape: f32[32,32], index: 3, kind: input, shape index: {}]   ;;  %s2740_s4 = inlined_call_operand.vmem [shape: f32[1,32], index: 4, kind: input, shape index: {}]   ;;  %s2741_s5 = inlined_call_operand.vmem [shape: f32[1,32], index: 5, kind: input, shape index: {}]   ;;  %s2742_s6 = inlined_call_operand.vmem [shape: f32[1,32], index: 6, kind: input, shape index: {}]   ;;  %s2743_s7 = inlined_call_operand.vmem [shape: f32[32,128], index: 7, kind: input, shape index: {}]   ;;  %s2744_s8 = inlined_call_operand.vmem [shape: f32[1,128], index: 8, kind: input, shape index: {}]   ;;  %s2745_s9 = inlined_call_operand.vmem [shape: f32[128,32], index: 9, kind: input, shape index: {}]   ;;  %s2746_s10 = inlined_call_operand.vmem [shape: f32[1,32], index: 10, kind: input, shape index: {}]   ;;  %s2747_s11 = inlined_call_operand.vmem [shape: f32[1,32], index: 11, kind: input, shape index: {}]   ;;  %s2748_s12 = inlined_call_operand.vmem [shape: f32[1,32], index: 12, kind: input, shape index: {}]   ;;  %s2749_s13 = inlined_call_operand.hbm [shape: f32[16,32], index: 13, kind: output, shape index: {}]  }
   0x1   :  { %v47_v0 = vld [vmem:[%s2738_s2] sm:$0xff]  ;;  %v48_v1 = vld [vmem:[%s2738_s2 + $0x8] sm:$0xff]  ;;  %v49_v2 = vld [vmem:[%s2738_s2 + $0x10] sm:$0xff] }
   0x2   :  { %v2174_v3 = vpack.c.bf16 %v48_v1, %v47_v0  ;;  %v50_v4 = vld [vmem:[%s2738_s2 + $0x18] sm:$0xff]  ;;  %v51_v6 = vld [vmem:[%s2738_s2 + $0x20] sm:$0xff]  ;;  %v52_v7 = vld [vmem:[%s2738_s2 + $0x28] sm:$0xff] }
   0x3   :  { %v2178_v5 = vpack.c.bf16 %v50_v4, %v49_v2  ;;  %v2437_v8 = vld [vmem:[%s2736_s0] sm:$0xff] }
   0x4   :  { %2175 = vmatprep.subr.bf16.mxu1 %v2174_v3 }
   0x5   :  { %2177 = vmatpush3.bf16.msra.mxu1 %v2174_v3 }
   0x6   :  { %18 = vsyncpa [#allocation4], 0  ;;  %2179 = vmatprep.subr.bf16.mxu1 %v2178_v5  ;;  %v2182_v9 = vpack.c.bf16 %v52_v7, %v51_v6  ;;  %2034 = vmatprep.mubr.msk.f32.mxu1 %vm59_vm0, %v2437_v8  ;;  %v53_v10 = vld [vmem:[%s2738_s2 + $0x30] sm:$0xff]  ;;  %v54_v11 = vld [vmem:[%s2738_s2 + $0x38] sm:$0xff]  ;;  %v2328_v20 = vmov 0.0   ;;  %vm2329_vm1 = vmmov 0  }
   0x7   :  { %v2186_v12 = vpack.c.bf16 %v54_v11, %v53_v10  ;;  %v55_v13 = vld [vmem:[%s2738_s2 + $0x40] sm:$0xff]  ;;  %v56_v14 = vld [vmem:[%s2738_s2 + $0x48] sm:$0xff]  ;;  %v57_v16 = vld [vmem:[%s2738_s2 + $0x50] sm:$0xff]  ;;  %2067 = vmatprep.subr.mxu0 %v2328_v20  ;;  %2069 = vmatprep.mubr.msk.f32.mxu0 %vm2329_vm1, %v2328_v20  ;;  %vm148_vm2 = vcmask 64512   ;;  %s2331_s22 = smov 64   ;;  %s2333_s23 = smov 120  }
   0x8   :  { %v2190_v15 = vpack.c.bf16 %v56_v14, %v55_v13  ;;  %v58_v17 = vld [vmem:[%s2738_s2 + $0x58] sm:$0xff]  ;;  %v2462_v19 = vld [vmem:[%s2736_s0 + $0x8] sm:$0xff]  ;;  %s2330_s0 = smov 96   ;;  %v141_v25 = vld [vmem:[%s2737_s1] sm:$0xff]  ;;  %s2334_s24 = smov 56   ;;  %vm814_vm3 = vcmask 130112  }
   0x9   :  { %2181 = vmatpush3.bf16.msra.mxu1 %v2178_v5  ;;  %v2194_v18 = vpack.c.bf16 %v58_v17, %v57_v16  ;;  %v2493_v26 = vmul.f32 -1e+20, %v141_v25  ;;  %v142_v27 = vld [vmem:[%s2737_s1 + $0x8] sm:$0xff]  ;;  %s2332_s1 = smov 88   ;;  %s2335_s25 = smov 80   ;;  %vm1155_vm4 = vcmask 195712  }
   0xa   :  { %2183 = vmatprep.subr.bf16.mxu1 %v2182_v9  ;;  %v2499_v31 = vmul.f32 -1e+20, %v142_v27  ;;  %s2336_s26 = smov 112   ;;  %s2337_s27 = smov 48   ;;  %vm1496_vm5 = vcmask 261312   ;;  %vm1512_vm6 = vcmask 261120  }
   0xb   :  { %s2338_s28 = smov 72   ;;  %s2339_s29 = smov 104  }
   0xc   :  { %s2340_s30 = smov 40   ;;  %s2341_s14 = smov 8  }
   0xd   :  { %2185 = vmatpush3.bf16.msra.mxu1 %v2182_v9  ;;  %s2342_s15 = smov 16  }
   0xe   :  { %2187 = vmatprep.subr.bf16.mxu1 %v2186_v12 }
  0x11   :  { %2189 = vmatpush3.bf16.msra.mxu1 %v2186_v12 }
  0x12   :  { %2191 = vmatprep.subr.bf16.mxu1 %v2190_v15 }
  0x15   :  { %2193 = vmatpush3.bf16.msra.mxu1 %v2190_v15 }
  0x16   :  { %2195 = vmatprep.subr.bf16.mxu1 %v2194_v18 }
  0x19   :  { %2197 = vmatpush3.bf16.msra.mxu1 %v2194_v18 }
  0x1a   :  { %2037 = vmatprep.subr.mxu1 %v2328_v20 }
  0x1c   :  { %2035 = vmatmul.mubr.msk.f32.vlgmr.msra.gmra.mrb[0].mxu1 %vm59_vm0, %v2462_v19 }
  0x1d   :  { %2039 = vmatprep.mubr.msk.f32.mxu1 %vm2329_vm1, %v2328_v20 }
  0xef   :  { %v2472_v21 = vpop.f32.mrb[0].mxu1 }
  0xf0   :  { %v2474_v22 = vpop.f32.mrb[1].mxu1 }
  0xf1   :  { %146 = vrot.lane.b32.xlu0 %v2474_v22, %s2330_s0 }
  0xf5   :  { %224 = vrot.lane.b32.xlu0 %v2472_v21, %s2330_s0 }
 0x163   :  { %v147_v23 = vpop.permute.xlu0 %146 }
 0x164   :  { %2038 = vmatpush3.xpose.msk.msra.mxu1 %vm148_vm2, %v147_v23 }
 0x165   :  { %2042 = vmatprep.subr.mxu1 %v2328_v20 }
 0x167   :  { %2040 = vmatmul.mubr.msk.f32.vlgmr.msra.gmra.mrb[2].mxu1 %vm148_vm2, %v2474_v22  ;;  %v225_v24 = vpop.permute.xlu0 %224 }
 0x168   :  { %2043 = vmatpush3.xpose.msk.msra.mxu1 %vm148_vm2, %v225_v24  ;;  %2044 = vmatprep.mubr.msk.f32.mxu1 %vm2329_vm1, %v2328_v20 }
 0x169   :  { %2047 = vmatprep.subr.mxu1 %v2328_v20 }
 0x16b   :  { %2045 = vmatmul.mubr.msk.f32.vlgmr.msra.gmra.mrb[4].mxu1 %vm148_vm2, %v2472_v21 }
 0x16c   :  { %2049 = vmatprep.mubr.msk.f32.mxu1 %vm2329_vm1, %v2328_v20 }
 0x23a   :  { %v219_v28 = vpop.f32.mrb[2].mxu1 }
 0x23b   :  { %v220_v29 = vadd.f32 %v219_v28, %v2493_v26  ;;  %v2041_v30 = vpop.f32.mrb[3].mxu1 }
 0x23d   :  { %v300_v32 = vsel %vm148_vm2, %v220_v29, -inf }
 0x23e   :  { %301 = vmax.xlane.f32.xlu1 %v300_v32  ;;  %v296_v33 = vpop.f32.mrb[4].mxu1 }
 0x23f   :  { %v297_v34 = vadd.f32 %v296_v33, %v2499_v31  ;;  %v2046_v35 = vpop.f32.mrb[5].mxu1 }
 0x241   :  { %v303_v36 = vsel %vm148_vm2, %v297_v34, -inf }
 0x242   :  { %304 = vmax.xlane.f32.xlu1 %v303_v36 }
 0x253   :  { %322 = vrot.lane.b32.xlu1 %v2474_v22, %s2331_s22 }
 0x257   :  { %398 = vrot.lane.b32.xlu1 %v2472_v21, %s2331_s22  ;;  %s2343_s22 = smov 24  }
 0x25b   :  { %478 = vrot.lane.b32.xlu1 %v2474_v22, %s2332_s1 }
 0x25f   :  { %476 = vrot.lane.b32.xlu1 %v2474_v22, %s2333_s23 }
 0x2cb   :  { %v302_v37 = vpop.xlane.xlu1 %301 }
 0x2cc   :  { %v306_v38 = vsub.f32 %v220_v29, %v302_v37 }
 0x2ce   :  { %v308_v39 = vmul.f32 1.442695, %v306_v38 }
 0x2cf   :  { %v305_v40 = vpop.xlane.xlu1 %304 }
 0x2d0   :  { %2264 = vpow2.f32 %v308_v39  ;;  %v307_v41 = vsub.f32 %v297_v34, %v305_v40 }
 0x2d2   :  { %v310_v42 = vmul.f32 1.442695, %v307_v41 }
 0x2d3   :  { %v323_v43 = vpop.permute.xlu1 %322 }
 0x2d4   :  { %2266 = vpow2.f32 %v310_v42  ;;  %2048 = vmatpush3.msra.mxu1 %v323_v43 }
 0x2d5   :  { %2052 = vmatprep.subr.mxu1 %v2328_v20 }
 0x2d7   :  { %v399_v48 = vpop.permute.xlu1 %398 }
 0x2da   :  { %v2265_v44 = vpop.eup %2264 }
 0x2db   :  { %v312_v45 = vsel %vm148_vm2, %v2265_v44, 0.0  ;;  %v479_v49 = vpop.permute.xlu1 %478 }
 0x2dc   :  { %313 = vadd.xlane.f32.xlu0 %v312_v45 }
 0x2de   :  { %v2267_v46 = vpop.eup %2266 }
 0x2df   :  { %v315_v47 = vsel %vm148_vm2, %v2267_v46, 0.0  ;;  %v477_v50 = vpop.permute.xlu1 %476 }
 0x2e0   :  { %316 = vadd.xlane.f32.xlu1 %v315_v47 }
 0x2f1   :  { %554 = vrot.lane.b32.xlu1 %v2472_v21, %s2333_s23  ;;  %s2344_s23 = smov [#allocation3]  }
 0x2f2   :  { %556 = vrot.lane.b32.xlu0 %v2472_v21, %s2332_s1 }
 0x369   :  { %v314_v51 = vpop.xlane.xlu0 %313 }
 0x36a   :  { %2268 = vrcp.f32 %v314_v51 }
 0x36d   :  { %v317_v52 = vpop.xlane.xlu1 %316  ;;  %v557_v57 = vpop.permute.xlu0 %556 }
 0x36e   :  { %2270 = vrcp.f32 %v317_v52 }
 0x371   :  { %v555_v58 = vpop.permute.xlu1 %554 }
 0x374   :  { %v2269_v53 = vpop.eup %2268 }
 0x375   :  { %v320_v54 = vmul.f32 %v2269_v53, %v2265_v44 }
 0x377   :  { %2050 = vmatmul.mubr.msk.f32.vlgmr.msra.gmra.mrb[6].mxu1 %vm148_vm2, %v320_v54 }
 0x378   :  { %v2271_v55 = vpop.eup %2270  ;;  %2053 = vmatpush3.msra.mxu1 %v399_v48  ;;  %2054 = vmatprep.mubr.msk.f32.mxu1 %vm2329_vm1, %v2328_v20 }
 0x379   :  { %v321_v56 = vmul.f32 %v2271_v55, %v2267_v46  ;;  %2057 = vmatprep.subr.mxu1 %v2328_v20 }
 0x37b   :  { %2055 = vmatmul.mubr.msk.f32.vlgmr.msra.gmra.mrb[8].mxu1 %vm148_vm2, %v321_v56 }
 0x37c   :  { %2059 = vmatprep.mubr.msk.f32.mxu1 %vm2329_vm1, %v2328_v20 }
 0x37f   :  { %2058 = vmatpush3.xpose.msk.msra.mxu1 %vm148_vm2, %v479_v49 }
 0x380   :  { %2062 = vmatprep.subr.mxu1 %v2328_v20 }
 0x382   :  { %2060 = vmatmul.mubr.msk.f32.vlgmr.msra.gmra.mrb[10].mxu1 %vm148_vm2, %v477_v50 }
 0x383   :  { %2063 = vmatpush3.xpose.msk.msra.mxu1 %vm148_vm2, %v557_v57  ;;  %2064 = vmatprep.mubr.msk.f32.mxu1 %vm2329_vm1, %v2328_v20 }
 0x384   :  { %2072 = vmatprep.subr.mxu1 %v2328_v20 }
 0x386   :  { %2065 = vmatmul.mubr.msk.f32.vlgmr.msra.gmra.mrb[12].mxu1 %vm148_vm2, %v555_v58 }
 0x387   :  { %2074 = vmatprep.mubr.msk.f32.mxu1 %vm2329_vm1, %v2328_v20 }
 0x44a   :  { %v394_v59 = vpop.f32.mrb[6].mxu1 }
 0x44b   :  { %474 = vst.msk [vmem:[#allocation2] sm:$0xff] %vm148_vm2, %v394_v59  ;;  %v2051_v60 = vpop.f32.mrb[7].mxu1 }
 0x44e   :  { %v470_v61 = vpop.f32.mrb[8].mxu1 }
 0x44f   :  { %475 = vst.msk [vmem:[#allocation2 + $0x8] sm:$0xff] %vm148_vm2, %v470_v61  ;;  %v2056_v62 = vpop.f32.mrb[9].mxu1 }
 0x455   :  { %v550_v63 = vpop.f32.mrb[10].mxu1 }
 0x456   :  { %v551_v0 = vadd.f32 %v550_v63, %v2493_v26  ;;  %v2061_v1 = vpop.f32.mrb[11].mxu1 }
 0x458   :  { %v632_v2 = vsel %vm148_vm2, %v551_v0, -inf }
 0x459   :  { %633 = vmax.xlane.f32.xlu1 %v632_v2  ;;  %v628_v3 = vpop.f32.mrb[12].mxu1 }
 0x45a   :  { %v629_v4 = vadd.f32 %v628_v3, %v2499_v31  ;;  %v2066_v5 = vpop.f32.mrb[13].mxu1 }
 0x45c   :  { %v635_v6 = vsel %vm148_vm2, %v629_v4, -inf }
 0x45d   :  { %636 = vmax.xlane.f32.xlu0 %v635_v6 }
 0x46a   :  { %654 = vrot.lane.b32.xlu1 %v2474_v22, %s2334_s24 }
 0x46e   :  { %819 = vrot.lane.b32.xlu1 %v2474_v22, %s2335_s25 }
 0x472   :  { %897 = vrot.lane.b32.xlu1 %v2472_v21, %s2335_s25 }
 0x473   :  { %730 = vrot.lane.b32.xlu0 %v2472_v21, %s2334_s24  ;;  %s1886_s24 = sshll.u32 %s2344_s23, 4  ;;  %s1887_s24 = int_to_ptr.vmem [resolvable:$true] %s1886_s24 }
 0x474   :  { %s2304_s25 = scalar_lea.vmem %s1887_s24, 256  ;;  %p2309_p1 = scmp.lt.s32.totalorder %s1887_s24, %s1887_s24 }
 0x475   :  { %p2305_p0 = scmp.ne.s32.totalorder %s1887_s24, %s2304_s25  ;;  %p2310_p2 = scmp.lt.s32.totalorder %s2304_s25, %s2304_s25 }
 0x477   :  { %817 = vrot.lane.b32.xlu0 %v2474_v22, %s2336_s26  ;;  %p2311_p3 = por %p2310_p2, %p2309_p1 }
 0x479   :  { %p2312_p4 = pnand %p2311_p3, %p2305_p0 }
 0x4e6   :  { %v634_v7 = vpop.xlane.xlu1 %633 }
 0x4e7   :  { %v638_v9 = vsub.f32 %v551_v0, %v634_v7 }
 0x4e9   :  { %v640_v10 = vmul.f32 1.442695, %v638_v9 }
 0x4ea   :  { %v655_v11 = vpop.permute.xlu1 %654  ;;  %v637_v12 = vpop.xlane.xlu0 %636 }
 0x4eb   :  { %2272 = vpow2.f32 %v640_v10  ;;  %v639_v13 = vsub.f32 %v629_v4, %v637_v12  ;;  %2068 = vmatpush3.msra.mxu0 %v655_v11 }
 0x4ec   :  { %2077 = vmatprep.subr.mxu0 %v2328_v20 }
 0x4ed   :  { %v642_v14 = vmul.f32 1.442695, %v639_v13 }
 0x4ee   :  { %v731_v15 = vpop.permute.xlu0 %730  ;;  %v820_v24 = vpop.permute.xlu1 %819 }
 0x4ef   :  { %2274 = vpow2.f32 %v642_v14  ;;  %2073 = vmatpush3.msra.mxu1 %v731_v15 }
 0x4f0   :  { %2082 = vmatprep.subr.mxu1 %v2328_v20 }
 0x4f2   :  { %v898_v25 = vpop.permute.xlu1 %897  ;;  %v818_v34 = vpop.permute.xlu0 %817 }
 0x4f5   :  { %v2273_v16 = vpop.eup %2272 }
 0x4f6   :  { %v644_v17 = vsel %vm148_vm2, %v2273_v16, 0.0 }
 0x4f7   :  { %645 = vadd.xlane.f32.xlu1 %v644_v17 }
 0x4f9   :  { %v2275_v18 = vpop.eup %2274 }
 0x4fa   :  { %v647_v23 = vsel %vm148_vm2, %v2275_v18, 0.0 }
 0x4fb   :  { %648 = vadd.xlane.f32.xlu1 %v647_v23 }
 0x50c   :  { %895 = vrot.lane.b32.xlu1 %v2472_v21, %s2336_s26 }
 0x584   :  { %v646_v27 = vpop.xlane.xlu1 %645 }
 0x585   :  { %2276 = vrcp.f32 %v646_v27 }
 0x588   :  { %v649_v28 = vpop.xlane.xlu1 %648 }
 0x589   :  { %2278 = vrcp.f32 %v649_v28 }
 0x58c   :  { %v896_v35 = vpop.permute.xlu1 %895 }
 0x58f   :  { %v2277_v29 = vpop.eup %2276 }
 0x590   :  { %v652_v30 = vmul.f32 %v2277_v29, %v2273_v16 }
 0x592   :  { %2070 = vmatmul.mubr.msk.f32.vlgmr.msra.gmra.mrb[0].mxu0 %vm148_vm2, %v652_v30 }
 0x593   :  { %v2279_v32 = vpop.eup %2278  ;;  %2078 = vmatpush3.xpose.msk.msra.mxu0 %vm148_vm2, %v820_v24  ;;  %2079 = vmatprep.mubr.msk.f32.mxu0 %vm2329_vm1, %v2328_v20 }
 0x594   :  { %v653_v33 = vmul.f32 %v2279_v32, %v2275_v18  ;;  %2087 = vmatprep.subr.mxu0 %v2328_v20 }
 0x596   :  { %2075 = vmatmul.mubr.msk.f32.vlgmr.msra.gmra.mrb[14].mxu1 %vm148_vm2, %v653_v33  ;;  %2080 = vmatmul.mubr.msk.f32.vlgmr.msra.gmra.mrb[2].mxu0 %vm148_vm2, %v818_v34 }
 0x597   :  { %2083 = vmatpush3.xpose.msk.msra.mxu1 %vm148_vm2, %v898_v25  ;;  %2084 = vmatprep.mubr.msk.f32.mxu1 %vm2329_vm1, %v2328_v20 }
 0x598   :  { %2092 = vmatprep.subr.mxu1 %v2328_v20  ;;  %2089 = vmatprep.mubr.msk.f32.mxu0 %vm2329_vm1, %v2328_v20 }
 0x59a   :  { %2085 = vmatmul.mubr.msk.f32.vlgmr.msra.gmra.mrb[16].mxu1 %vm148_vm2, %v896_v35 }
 0x59b   :  { %2094 = vmatprep.mubr.msk.f32.mxu1 %vm2329_vm1, %v2328_v20 }
 0x665   :  { %v2562_v36 = vpop.f32.mrb[0].mxu0 }
 0x666   :  { %v2071_v37 = vpop.f32.mrb[1].mxu0 }
 0x669   :  { %v2564_v38 = vpop.f32.mrb[14].mxu1  ;;  %v891_v39 = vpop.f32.mrb[2].mxu0 }
 0x66a   :  { %v892_v40 = vadd.f32 %v891_v39, %v2493_v26  ;;  %v2076_v41 = vpop.f32.mrb[15].mxu1  ;;  %v2081_v42 = vpop.f32.mrb[3].mxu0 }
 0x66c   :  { %v973_v43 = vsel %vm148_vm2, %v892_v40, -inf }
 0x66d   :  { %974 = vmax.xlane.f32.xlu0 %v973_v43  ;;  %v969_v44 = vpop.f32.mrb[16].mxu1  ;;  %v1502_v43 = vld [vmem:[%s2739_s3 + $0x8] sm:$0xff] }
 0x66e   :  { %v970_v45 = vadd.f32 %v969_v44, %v2499_v31  ;;  %v2086_v46 = vpop.f32.mrb[17].mxu1 }
 0x66f   :  { %v1504_v46 = vld [vmem:[%s2739_s3 + $0x18] sm:$0xff] }
 0x670   :  { %v976_v47 = vsel %vm148_vm2, %v970_v45, -inf }
 0x671   :  { %977 = vmax.xlane.f32.xlu1 %v976_v47 }
 0x682   :  { %995 = vrot.lane.b32.xlu1 %v2474_v22, %s2337_s27 }
 0x683   :  { %1071 = vrot.lane.b32.xlu0 %v2472_v21, %s2337_s27 }
 0x686   :  { %1160 = vrot.lane.b32.xlu1 %v2474_v22, %s2338_s28 }
 0x68a   :  { %1238 = vrot.lane.b32.xlu1 %v2472_v21, %s2338_s28 }
 0x68e   :  { %1236 = vrot.lane.b32.xlu1 %v2472_v21, %s2339_s29 }
 0x6fa   :  { %v975_v48 = vpop.xlane.xlu0 %974 }
 0x6fb   :  { %v979_v49 = vsub.f32 %v892_v40, %v975_v48 }
 0x6fd   :  { %v981_v50 = vmul.f32 1.442695, %v979_v49 }
 0x6fe   :  { %v1072_v51 = vpop.permute.xlu0 %1071  ;;  %v978_v52 = vpop.xlane.xlu1 %977 }
 0x6ff   :  { %2280 = vpow2.f32 %v981_v50  ;;  %v980_v53 = vsub.f32 %v970_v45, %v978_v52  ;;  %2093 = vmatpush3.msra.mxu1 %v1072_v51  ;;  %v1503_v45 = vld [vmem:[%s2739_s3 + $0x10] sm:$0xff] }
 0x700   :  { %2102 = vmatprep.subr.mxu1 %v2328_v20  ;;  %v2202_v47 = vpack.c.bf16 %v1504_v46, %v1503_v45  ;;  %v1743_v45 = vld [vmem:[%s2745_s9 + $0x40] sm:$0xff]  ;;  %v1744_v46 = vld [vmem:[%s2745_s9 + $0x48] sm:$0xff] }
 0x701   :  { %v983_v54 = vmul.f32 1.442695, %v980_v53 }
 0x702   :  { %v996_v55 = vpop.permute.xlu1 %995 }
 0x703   :  { %2282 = vpow2.f32 %v983_v54  ;;  %2088 = vmatpush3.msra.mxu0 %v996_v55 }
 0x704   :  { %2097 = vmatprep.subr.mxu0 %v2328_v20 }
 0x706   :  { %v1161_v62 = vpop.permute.xlu1 %1160 }
 0x709   :  { %v2281_v56 = vpop.eup %2280 }
 0x70a   :  { %v985_v57 = vsel %vm148_vm2, %v2281_v56, 0.0  ;;  %v1239_v2 = vpop.permute.xlu1 %1238 }
 0x70b   :  { %986 = vadd.xlane.f32.xlu0 %v985_v57 }
 0x70d   :  { %v2283_v58 = vpop.eup %2282 }
 0x70e   :  { %v988_v59 = vsel %vm148_vm2, %v2283_v58, 0.0  ;;  %v1237_v5 = vpop.permute.xlu1 %1236 }
 0x70f   :  { %989 = vadd.xlane.f32.xlu0 %v988_v59 }
 0x725   :  { %1158 = vrot.lane.b32.xlu0 %v2474_v22, %s2339_s29 }
 0x798   :  { %v987_v60 = vpop.xlane.xlu0 %986 }
 0x799   :  { %2284 = vrcp.f32 %v987_v60 }
 0x79c   :  { %v990_v61 = vpop.xlane.xlu0 %989 }
 0x79d   :  { %2286 = vrcp.f32 %v990_v61 }
 0x7a0   :  { %v1159_v4 = vpop.permute.xlu0 %1158 }
 0x7a3   :  { %v2285_v63 = vpop.eup %2284 }
 0x7a4   :  { %v993_v0 = vmul.f32 %v2285_v63, %v2281_v56  ;;  %v1923_v56 = vld [vmem:[%s2740_s4] ss:$0 sm:$0xff] }
 0x7a6   :  { %2090 = vmatmul.mubr.msk.f32.vlgmr.msra.gmra.mrb[4].mxu0 %vm148_vm2, %v993_v0 }
 0x7a7   :  { %v2287_v1 = vpop.eup %2286  ;;  %2098 = vmatpush3.xpose.msk.msra.mxu0 %vm148_vm2, %v1161_v62  ;;  %2099 = vmatprep.mubr.msk.f32.mxu0 %vm2329_vm1, %v2328_v20 }
 0x7a8   :  { %v994_v3 = vmul.f32 %v2287_v1, %v2283_v58  ;;  %2107 = vmatprep.subr.mxu0 %v2328_v20 }
 0x7aa   :  { %2095 = vmatmul.mubr.msk.f32.vlgmr.msra.gmra.mrb[18].mxu1 %vm148_vm2, %v994_v3  ;;  %2100 = vmatmul.mubr.msk.f32.vlgmr.msra.gmra.mrb[6].mxu0 %vm148_vm2, %v1159_v4 }
 0x7ab   :  { %2103 = vmatpush3.xpose.msk.msra.mxu1 %vm148_vm2, %v1239_v2  ;;  %2104 = vmatprep.mubr.msk.f32.mxu1 %vm2329_vm1, %v2328_v20 }
 0x7ac   :  { %2112 = vmatprep.subr.mxu1 %v2328_v20  ;;  %2109 = vmatprep.mubr.msk.f32.mxu0 %vm2329_vm1, %v2328_v20 }
 0x7ae   :  { %2105 = vmatmul.mubr.msk.f32.vlgmr.msra.gmra.mrb[20].mxu1 %vm148_vm2, %v1237_v5 }
 0x7af   :  { %2114 = vmatprep.mubr.msk.f32.mxu1 %vm2329_vm1, %v2328_v20 }
 0x879   :  { %v1067_v6 = vpop.f32.mrb[4].mxu0 }
 0x87a   :  { %v2091_v7 = vpop.f32.mrb[5].mxu0 }
 0x87d   :  { %v1143_v9 = vpop.f32.mrb[18].mxu1  ;;  %v1232_v10 = vpop.f32.mrb[6].mxu0 }
 0x87e   :  { %v1233_v11 = vadd.f32 %v1232_v10, %v2493_v26  ;;  %v2096_v12 = vpop.f32.mrb[19].mxu1  ;;  %v2101_v13 = vpop.f32.mrb[7].mxu0 }
 0x87f   :  { %v1643_v13 = vld [vmem:[%s2743_s7 + $0x10] sm:$0xff] }
 0x880   :  { %v1314_v14 = vsel %vm148_vm2, %v1233_v11, -inf }
 0x881   :  { %1315 = vmax.xlane.f32.xlu0 %v1314_v14  ;;  %v1310_v15 = vpop.f32.mrb[20].mxu1  ;;  %v1644_v14 = vld [vmem:[%s2743_s7 + $0x18] sm:$0xff] }
 0x882   :  { %v1311_v16 = vadd.f32 %v1310_v15, %v2499_v31  ;;  %v2106_v17 = vpop.f32.mrb[21].mxu1  ;;  %v2210_v15 = vpack.c.bf16 %v1644_v14, %v1643_v13 }
 0x883   :  { %v1736_v17 = vld [vmem:[%s2745_s9 + $0x8] sm:$0xff] }
 0x884   :  { %v1317_v18 = vsel %vm148_vm2, %v1311_v16, -inf }
 0x885   :  { %1318 = vmax.xlane.f32.xlu1 %v1317_v18 }
 0x896   :  { %1336 = vrot.lane.b32.xlu1 %v2474_v22, %s2340_s30 }
 0x89a   :  { %808 = vrot.lane.b32.xlu1 %v2562_v36, %s2341_s14 }
 0x89e   :  { %810 = vrot.lane.b32.xlu1 %v2564_v38, %s2341_s14 }
 0x8a2   :  { %1151 = vrot.lane.b32.xlu1 %v1143_v9, %s2342_s15 }
 0x90e   :  { %v1316_v20 = vpop.xlane.xlu0 %1315 }
 0x90f   :  { %v1320_v26 = vsub.f32 %v1233_v11, %v1316_v20  ;;  %v1642_v11 = vld [vmem:[%s2743_s7 + $0x8] sm:$0xff] }
 0x911   :  { %v1322_v31 = vmul.f32 1.442695, %v1320_v26 }
 0x912   :  { %v1319_v23 = vpop.xlane.xlu1 %1318 }
 0x913   :  { %2288 = vpow2.f32 %v1322_v31  ;;  %v1321_v24 = vsub.f32 %v1311_v16, %v1319_v23  ;;  %v1735_v16 = vld [vmem:[%s2745_s9] sm:$0xff] }
 0x914   :  { %v2214_v18 = vpack.c.bf16 %v1736_v17, %v1735_v16 }
 0x915   :  { %v1324_v25 = vmul.f32 1.442695, %v1321_v24 }
 0x916   :  { %v1337_v27 = vpop.permute.xlu1 %1336 }
 0x917   :  { %2290 = vpow2.f32 %v1324_v25  ;;  %2108 = vmatpush3.msra.mxu0 %v1337_v27 }
 0x91a   :  { %v809_v22 = vpop.permute.xlu1 %808 }
 0x91b   :  { %815 = vst.msk [vmem:[#allocation2] sm:$0xff] %vm814_vm3, %v809_v22  ;;  %v1926_v22 = vld [vmem:[%s2741_s5] ss:$0 sm:$0xff] }
 0x91d   :  { %v2289_v28 = vpop.eup %2288 }
 0x91e   :  { %v811_v29 = vpop.permute.xlu1 %810  ;;  %v1326_v30 = vsel %vm148_vm2, %v2289_v28, 0.0 }
 0x91f   :  { %816 = vst.msk [vmem:[#allocation2 + $0x8] sm:$0xff] %vm814_vm3, %v811_v29  ;;  %1327 = vadd.xlane.f32.xlu0 %v1326_v30  ;;  %v1927_v29 = vld [vmem:[%s2742_s6] ss:$0 sm:$0xff] }
 0x921   :  { %v2291_v32 = vpop.eup %2290 }
 0x922   :  { %v1152_v33 = vpop.permute.xlu1 %1151  ;;  %v1329_v34 = vsel %vm148_vm2, %v2291_v32, 0.0 }
 0x923   :  { %1157 = vst.msk [vmem:[#allocation2 + $0x8] sm:$0xff] %vm1155_vm4, %v1152_v33  ;;  %1330 = vadd.xlane.f32.xlu0 %v1329_v34 }
 0x939   :  { %1412 = vrot.lane.b32.xlu0 %v2472_v21, %s2340_s30  ;;  %v1501_v21 = vld [vmem:[%s2739_s3] sm:$0xff] }
 0x93a   :  { %v2198_v44 = vpack.c.bf16 %v1502_v43, %v1501_v21  ;;  %v1741_v21 = vld [vmem:[%s2745_s9 + $0x30] sm:$0xff]  ;;  %v1742_v43 = vld [vmem:[%s2745_s9 + $0x38] sm:$0xff] }
 0x93c   :  { %2199 = vmatprep.subr.bf16.mxu0 %v2198_v44 }
 0x93d   :  { %1149 = vrot.lane.b32.xlu0 %v1067_v6, %s2342_s15 }
 0x9ac   :  { %v1328_v35 = vpop.xlane.xlu0 %1327 }
 0x9ad   :  { %2292 = vrcp.f32 %v1328_v35  ;;  %v1737_v35 = vld [vmem:[%s2745_s9 + $0x10] sm:$0xff] }
 0x9b0   :  { %v1331_v36 = vpop.xlane.xlu0 %1330 }
 0x9b1   :  { %2294 = vrcp.f32 %v1331_v36  ;;  %v1738_v36 = vld [vmem:[%s2745_s9 + $0x18] sm:$0xff] }
 0x9b4   :  { %v1413_v37 = vpop.permute.xlu0 %1412 }
 0x9b5   :  { %2113 = vmatpush3.msra.mxu1 %v1413_v37 }
 0x9b7   :  { %v2293_v38 = vpop.eup %2292 }
 0x9b8   :  { %v1334_v39 = vmul.f32 %v2293_v38, %v2289_v28  ;;  %v1150_v40 = vpop.permute.xlu0 %1149 }
 0x9b9   :  { %1156 = vst.msk [vmem:[#allocation2] sm:$0xff] %vm1155_vm4, %v1150_v40  ;;  %v1739_v40 = vld [vmem:[%s2745_s9 + $0x20] sm:$0xff] }
 0x9ba   :  { %2110 = vmatmul.mubr.msk.f32.vlgmr.msra.gmra.mrb[8].mxu0 %vm148_vm2, %v1334_v39  ;;  %v2218_v39 = vpack.c.bf16 %v1738_v36, %v1737_v35 }
 0x9bb   :  { %v2295_v41 = vpop.eup %2294  ;;  %2201 = vmatpush3.bf16.msra.mxu0 %v2198_v44  ;;  %v2226_v44 = vpack.c.bf16 %v1742_v43, %v1741_v21 }
 0x9bc   :  { %v1335_v42 = vmul.f32 %v2295_v41, %v2291_v32  ;;  %2203 = vmatprep.subr.bf16.mxu0 %v2202_v47  ;;  %v1740_v41 = vld [vmem:[%s2745_s9 + $0x28] sm:$0xff] }
 0x9be   :  { %2115 = vmatmul.mubr.msk.f32.vlgmr.msra.gmra.mrb[22].mxu1 %vm148_vm2, %v1335_v42  ;;  %v2222_v42 = vpack.c.bf16 %v1740_v41, %v1739_v40 }
 0x9bf   :  { %2205 = vmatpush3.bf16.msra.mxu0 %v2202_v47  ;;  %v2230_v47 = vpack.c.bf16 %v1744_v46, %v1743_v45 }
 0xa8d   :  { %v1408_v48 = vpop.f32.mrb[8].mxu0 }
 0xa8e   :  { %1490 = vrot.lane.b32.xlu0 %v1408_v48, %s2343_s22  ;;  %v2111_v49 = vpop.f32.mrb[9].mxu0  ;;  %v1745_v48 = vld [vmem:[%s2745_s9 + $0x50] sm:$0xff] }
 0xa8f   :  { %v1746_v49 = vld [vmem:[%s2745_s9 + $0x58] sm:$0xff] }
 0xa91   :  { %v1484_v50 = vpop.f32.mrb[22].mxu1 }
 0xa92   :  { %1492 = vrot.lane.b32.xlu1 %v1484_v50, %s2343_s22  ;;  %v2116_v51 = vpop.f32.mrb[23].mxu1  ;;  %v2234_v50 = vpack.c.bf16 %v1746_v49, %v1745_v48 }
 0xa93   :  { %v1747_v51 = vld [vmem:[%s2745_s9 + $0x60] sm:$0xff] }
 0xb00   :  { %v1491_v52 = vpop.permute.xlu0 %1490 }
 0xb01   :  { %1497 = vst.msk [vmem:[#allocation2] sm:$0xff] %vm1496_vm5, %v1491_v52  ;;  %v1748_v52 = vld [vmem:[%s2745_s9 + $0x68] sm:$0xff] }
 0xb04   :  { %v1493_v53 = vpop.permute.xlu1 %1492 }
 0xb05   :  { %1498 = vst.msk [vmem:[#allocation2 + $0x8] sm:$0xff] %vm1496_vm5, %v1493_v53  ;;  %v2238_v53 = vpack.c.bf16 %v1748_v52, %v1747_v51 }
 0xb08   :  { %v1499_v54 = vld [vmem:[#allocation2] sm:$0xff] }
 0xb09   :  { %2125 = vmatprep.mubr.msk.f32.mxu0 %vm1512_vm6, %v1499_v54  ;;  %v1749_v54 = vld [vmem:[%s2745_s9 + $0x70] sm:$0xff] }
 0xb0c   :  { %v1500_v55 = vld [vmem:[#allocation2 + $0x8] sm:$0xff] }
 0xb0d   :  { %2126 = vmatmul.mubr.msk.f32.vlgmr.msra.gmra.mrb[10].mxu0 %vm1512_vm6, %v1500_v55  ;;  %v1750_v55 = vld [vmem:[%s2745_s9 + $0x78] sm:$0xff] }
 0xbe0   :  { %v2127_v57 = vpop.f32.mrb[10].mxu0 }
 0xbe1   :  { %v1591_v58 = vadd.f32 %v2127_v57, %v1923_v56  ;;  %v1585_v59 = vpop.f32.mrb[11].mxu0  ;;  %v1928_v57 = vld [vmem:[%s2744_s8] ss:$0 sm:$0xff] }
 0xbe2   :  { %v1586_v60 = vadd.f32 %v1923_v56, %v1585_v59  ;;  %v2242_v56 = vpack.c.bf16 %v1750_v55, %v1749_v54 }
 0xbe3   :  { %v1595_v61 = vadd.f32 %v1591_v58, %v2462_v19 }
 0xbe4   :  { %v1594_v62 = vadd.f32 %v1586_v60, %v2437_v8  ;;  %v1641_v8 = vld [vmem:[%s2743_s7] sm:$0xff] }
 0xbe5   :  { %v1599_v63 = vsel %vm1512_vm6, %v1595_v61, 0.0  ;;  %v2206_v12 = vpack.c.bf16 %v1642_v11, %v1641_v8 }
 0xbe6   :  { %1600 = vadd.xlane.f32.xlu1 %v1599_v63  ;;  %v1596_v0 = vsel %vm1512_vm6, %v1594_v62, 0.0 }
 0xbe7   :  { %1597 = vadd.xlane.f32.xlu0 %v1596_v0  ;;  %2207 = vmatprep.subr.bf16.mxu0 %v2206_v12  ;;  %v1931_v0 = vld [vmem:[%s2746_s10] ss:$0 sm:$0xff] }
 0xbe8   :  { %2209 = vmatpush3.bf16.msra.mxu0 %v2206_v12 }
 0xbe9   :  { %2211 = vmatprep.subr.bf16.mxu0 %v2210_v15 }
 0xbec   :  { %2213 = vmatpush3.bf16.msra.mxu0 %v2210_v15 }
 0xbed   :  { %2215 = vmatprep.subr.bf16.mxu0 %v2214_v18 }
 0xc73   :  { %v1601_v1 = vpop.xlane.xlu1 %1600 }
 0xc74   :  { %v1604_v2 = vmul.f32 0.03125, %v1601_v1  ;;  %v1598_v3 = vpop.xlane.xlu0 %1597 }
 0xc75   :  { %v1603_v4 = vmul.f32 0.03125, %v1598_v3 }
 0xc76   :  { %v1606_v5 = vsub.f32 %v1595_v61, %v1604_v2 }
 0xc77   :  { %v1605_v6 = vsub.f32 %v1594_v62, %v1603_v4 }
 0xc78   :  { %v1608_v10 = vmul.f32 %v1606_v5, %v1606_v5 }
 0xc79   :  { %v1607_v7 = vmul.f32 %v1605_v6, %v1605_v6 }
 0xc7a   :  { %v1612_v19 = vsel %vm1512_vm6, %v1608_v10, 0.0 }
 0xc7b   :  { %v1609_v9 = vsel %vm1512_vm6, %v1607_v7, 0.0 }
 0xc7c   :  { %1610 = vadd.xlane.f32.xlu0 %v1609_v9 }
 0xc80   :  { %1613 = vadd.xlane.f32.xlu0 %v1612_v19 }
 0xd09   :  { %v1611_v20 = vpop.xlane.xlu0 %1610 }
 0xd0a   :  { %v1615_v26 = vmul.f32 0.03125, %v1611_v20 }
 0xd0c   :  { %v1617_v31 = vadd.f32 1e-05, %v1615_v26 }
 0xd0d   :  { %v1614_v23 = vpop.xlane.xlu0 %1613 }
 0xd0e   :  { %2296 = vrsqrt.f32 %v1617_v31  ;;  %v1616_v24 = vmul.f32 0.03125, %v1614_v23 }
 0xd10   :  { %v1618_v25 = vadd.f32 1e-05, %v1616_v24 }
 0xd12   :  { %2298 = vrsqrt.f32 %v1618_v25 }
 0xd18   :  { %v2297_v27 = vpop.eup %2296 }
 0xd19   :  { %v1621_v28 = vmul.f32 %v2297_v27, %v1605_v6  ;;  %v1932_v27 = vld [vmem:[%s2747_s11] ss:$0 sm:$0xff] }
 0xd1b   :  { %v1630_v30 = vmul.f32 %v1926_v22, %v1621_v28 }
 0xd1c   :  { %v2299_v32 = vpop.eup %2298 }
 0xd1d   :  { %v1622_v33 = vmul.f32 %v2299_v32, %v1606_v5  ;;  %v1639_v34 = vadd.f32 %v1927_v29, %v1630_v30  ;;  %v1933_v30 = vld [vmem:[%s2748_s12] ss:$0 sm:$0xff] }
 0xd1f   :  { %v1631_v37 = vmul.f32 %v1926_v22, %v1622_v33  ;;  %2136 = vmatprep.mubr.msk.f32.mxu0 %vm1512_vm6, %v1639_v34 }
 0xd21   :  { %v1640_v38 = vadd.f32 %v1927_v29, %v1631_v37 }
 0xd23   :  { %2137 = vmatmul.mubr.msk.f32.vlgmr.msra.gmra.mrb[12].mxu0 %vm1512_vm6, %v1640_v38 }
 0xd24   :  { %2217 = vmatpush3.bf16.msra.mxu0 %v2214_v18 }
 0xd25   :  { %2219 = vmatprep.subr.bf16.mxu0 %v2218_v39 }
 0xd28   :  { %2221 = vmatpush3.bf16.msra.mxu0 %v2218_v39 }
 0xd29   :  { %2223 = vmatprep.subr.bf16.mxu0 %v2222_v42 }
 0xd2c   :  { %2225 = vmatpush3.bf16.msra.mxu0 %v2222_v42 }
 0xd2d   :  { %2227 = vmatprep.subr.bf16.mxu0 %v2226_v44 }
 0xd30   :  { %2229 = vmatpush3.bf16.msra.mxu0 %v2226_v44 }
 0xd31   :  { %2231 = vmatprep.subr.bf16.mxu0 %v2230_v47 }
 0xd34   :  { %2233 = vmatpush3.bf16.msra.mxu0 %v2230_v47 }
 0xd35   :  { %2235 = vmatprep.subr.bf16.mxu0 %v2234_v50 }
 0xd38   :  { %2237 = vmatpush3.bf16.msra.mxu0 %v2234_v50 }
 0xd39   :  { %2239 = vmatprep.subr.bf16.mxu0 %v2238_v53 }
 0xd3c   :  { %2241 = vmatpush3.bf16.msra.mxu0 %v2238_v53 }
 0xd3d   :  { %2243 = vmatprep.subr.bf16.mxu0 %v2242_v56 }
 0xd40   :  { %2245 = vmatpush3.bf16.msra.mxu0 %v2242_v56 }
 0xdf6   :  { %v2138_v58 = vpop.f32.mrb[12].mxu0 }
 0xdf7   :  { %v1730_v59 = vadd.f32 %v2138_v58, %v1928_v57  ;;  %v1724_v60 = vpop.f32.mrb[13].mxu0 }
 0xdf8   :  { %v1725_v61 = vadd.f32 %v1928_v57, %v1724_v60 }
 0xdf9   :  { %v1734_v63 = vmax.f32 %v1730_v59, 0.0 }
 0xdfa   :  { %v1733_v62 = vmax.f32 %v1725_v61, 0.0 }
 0xdfc   :  { %2171 = vmatprep.mubr.f32.mxu0 %v1733_v62 }
 0xdfd   :  { %2172 = vmatmul.mubr.f32.vlgmr.msra.gmra.mrb[14].mxu0 %v1734_v63 }
 0xed0   :  { %v2173_v1 = vpop.f32.mrb[14].mxu0 }
 0xed1   :  { %v1830_v2 = vadd.f32 %v2173_v1, %v1931_v0  ;;  %v1824_v3 = vpop.f32.mrb[15].mxu0 }
 0xed2   :  { %v1825_v4 = vadd.f32 %v1931_v0, %v1824_v3 }
 0xed3   :  { %v1834_v5 = vadd.f32 %v1830_v2, %v1640_v38 }
 0xed4   :  { %v1833_v6 = vadd.f32 %v1825_v4, %v1639_v34 }
 0xed5   :  { %v1838_v7 = vsel %vm1512_vm6, %v1834_v5, 0.0 }
 0xed6   :  { %1839 = vadd.xlane.f32.xlu0 %v1838_v7  ;;  %v1835_v9 = vsel %vm1512_vm6, %v1833_v6, 0.0 }
 0xed7   :  { %1836 = vadd.xlane.f32.xlu1 %v1835_v9 }
 0xf63   :  { %v1840_v10 = vpop.xlane.xlu0 %1839 }
 0xf64   :  { %v1842_v19 = vmul.f32 0.03125, %v1840_v10  ;;  %v1837_v8 = vpop.xlane.xlu1 %1836 }
 0xf65   :  { %v1841_v11 = vmul.f32 0.03125, %v1837_v8 }
 0xf66   :  { %v1844_v12 = vsub.f32 %v1834_v5, %v1842_v19 }
 0xf67   :  { %v1843_v13 = vsub.f32 %v1833_v6, %v1841_v11 }
 0xf68   :  { %v1846_v14 = vmul.f32 %v1844_v12, %v1844_v12 }
 0xf69   :  { %v1845_v15 = vmul.f32 %v1843_v13, %v1843_v13 }
 0xf6a   :  { %v1850_v16 = vsel %vm1512_vm6, %v1846_v14, 0.0 }
 0xf6b   :  { %1851 = vadd.xlane.f32.xlu0 %v1850_v16  ;;  %v1847_v17 = vsel %vm1512_vm6, %v1845_v15, 0.0 }
 0xf6c   :  { %1848 = vadd.xlane.f32.xlu1 %v1847_v17 }
 0xff8   :  { %v1852_v18 = vpop.xlane.xlu0 %1851 }
 0xff9   :  { %v1854_v20 = vmul.f32 0.03125, %v1852_v18  ;;  %v1849_v26 = vpop.xlane.xlu1 %1848 }
 0xffa   :  { %v1853_v31 = vmul.f32 0.03125, %v1849_v26 }
 0xffb   :  { %v1856_v23 = vadd.f32 1e-05, %v1854_v20 }
 0xffc   :  { %v1855_v24 = vadd.f32 1e-05, %v1853_v31 }
 0xffd   :  { %2300 = vrsqrt.f32 %v1856_v23 }
 0xffe   :  { %2302 = vrsqrt.f32 %v1855_v24 }
0x1007   :  { %v2301_v25 = vpop.eup %2300 }
0x1008   :  { %v2303_v22 = vpop.eup %2302  ;;  %v1860_v28 = vmul.f32 %v2301_v25, %v1844_v12 }
0x1009   :  { %v1859_v29 = vmul.f32 %v2303_v22, %v1843_v13 }
0x100a   :  { %v1869_v32 = vmul.f32 %v1932_v27, %v1860_v28 }
0x100b   :  { %v1868_v33 = vmul.f32 %v1932_v27, %v1859_v29 }
0x100c   :  { %v1878_v34 = vadd.f32 %v1933_v30, %v1869_v32 }
0x100d   :  { %v1877_v35 = vadd.f32 %v1933_v30, %v1868_v33 }
0x100e   :  { %1880 = vst.msk [vmem:[#allocation3 + $0x8] sm:$0xff] %vm1512_vm6, %v1878_v34 }
0x100f   :  { %1879 = vst.msk [vmem:[#allocation3] sm:$0xff] %vm1512_vm6, %v1877_v35 }
0x1010   :  { %2315 = shalt.err (!%p2312_p4)
}
0x1011   :  { %s2316_s26 = scalar_lea.hbm %s2749_s13, 256 }
0x1012   :  { %p2317_p5 = scmp.ne.s32.totalorder %s2749_s13, %s2316_s26  ;;  %p2320_p6 = scmp.lt.u32.totalorder %s2316_s26, %s2749_s13 }
0x1014   :  { %p2322_p7 = pnand %p2320_p6, %p2317_p5 }
0x1016   :  { %2325 = shalt.err (!%p2322_p7)
}
0x1017   :  { %s2345_s15 = smov 128  }
0x1018   :  { %1892 = dma.vmem_to_hbm [thread:$0]  %s1887_s24, 256, %s2749_s13, [#allocation4], %s2345_s15, %s2345_s15, %s2341_s14  }
0x1019   :  { %2326 = dma.done.wait [#allocation4], 256  }
0x101a   :  { %2327 = vsyncadd [#allocation4], 4294967040 }
0x101b   :  { %1896 = vsyncpa [#allocation4], 1 }

</bundles_post_ra>
